<compile_context>
chip_gen: v5e
topology: v5e:2x2
jax: 0.10.0
libtpu: 0.0.40
codegen_flags: <defaults>
</compile_context>

<pallas_src>
import functools

import jax
import jax.numpy as jnp
from jax.experimental import pallas as pl
from jax.experimental.pallas import tpu as pltpu


def _gemv_sigmoid_kernel(x_ref, w_ref, b_ref, out_ref):
    """out = sigmoid(x @ w^T + b) for one batch tile.

    x_ref:   [bt, in_dim]  VMEM (batch tile of the input)
    w_ref:   [1,  in_dim]  VMEM (folded weight row, constant across grid)
    b_ref:   [1, 1]        SMEM (folded bias scalar)
    out_ref: [bt, 1]       VMEM
    """
    x = x_ref[...]
    w = w_ref[...]                    # [1, in_dim], broadcast across rows (VPU)
    b = b_ref[0, 0]                   # SMEM scalar
    # N=1 contraction via VPU mul + XLU lane reduce instead of an MXU matmul.
    logits = jnp.sum(x * w, axis=-1, keepdims=True) + b
    out_ref[...] = jax.nn.sigmoid(logits).astype(out_ref.dtype)


def fold_params(params):
    """Fold the activation-free Linear chain into a single affine map."""
    (w1, b1, w2, b2, w3, b3, w4, b4, wo, bo) = params
    z2_dim = w2.shape[1]
    wo2 = wo[:z2_dim, :]                                   # [z2_dim, 1]
    wo4 = wo[z2_dim:, :]                                   # [z4_dim, 1]
    v = w2 @ wo2 + w3 @ (w4 @ wo4)                         # [z1_dim, 1]
    w_eff = (w1 @ v).T                                     # [1, in_dim]
    b_eff = b1 @ v + b2 @ wo2 + (b3 @ w4 + b4) @ wo4 + bo  # [1, 1]
    return w_eff, b_eff


def _round_up(n, m):
    return (n + m - 1) // m * m


@functools.partial(jax.jit, static_argnames=("batch_tile",))
def mlp_forward(x, params, *, batch_tile=None):
    """Fused Pallas forward. x: [B, in_dim] float32 -> [B, 1] float32."""
    w_eff, b_eff = fold_params(params)
    B, in_dim = x.shape

    if batch_tile is None:
        # Big enough to amortize the ~0.35 us per-grid-step overhead, small
        # enough to keep many grid steps (double-buffering + both TCs on v7x)
        # and stay far below scoped VMEM even on v7x (tile = bt*in_dim*4 B).
        batch_tile = min(1024, _round_up(B, 8))
    batch_tile = max(8, _round_up(batch_tile, 8))

    b_padded = _round_up(B, batch_tile)
    if b_padded != B:
        x = jnp.pad(x, ((0, b_padded - B), (0, 0)))

    grid = (b_padded // batch_tile,)

    out = pl.pallas_call(
        _gemv_sigmoid_kernel,
        out_shape=jax.ShapeDtypeStruct((b_padded, 1), jnp.float32),
        grid=grid,
        in_specs=[
            pl.BlockSpec((batch_tile, in_dim), lambda i: (i, 0)),  # x batch tile
            pl.BlockSpec((1, in_dim), lambda i: (0, 0)),           # W_eff (resident)
            pl.BlockSpec(memory_space=pltpu.MemorySpace.SMEM),     # b_eff scalar
        ],
        out_specs=pl.BlockSpec((batch_tile, 1), lambda i: (i, 0)),
        compiler_params=pltpu.CompilerParams(
            dimension_semantics=("parallel",)),
    )(x, w_eff, b_eff)

    return out[:B]


def init_params(key, in_dim, z1_dim, z2_dim, z3_dim, z4_dim):
    """Deterministic init mirroring nn.Linear shapes; stored as [in, out]."""
    def linear(k, fan_in, fan_out):
        kw, kb = jax.random.split(k)
        bound = 1.0 / jnp.sqrt(fan_in)
        w = jax.random.uniform(kw, (fan_in, fan_out), jnp.float32, -bound, bound)
        b = jax.random.uniform(kb, (1, fan_out), jnp.float32, -bound, bound)
        return w, b

    k1, k2, k3, k4, k5 = jax.random.split(key, 5)
    w1, b1 = linear(k1, in_dim, z1_dim)
    w2, b2 = linear(k2, z1_dim, z2_dim)
    w3, b3 = linear(k3, z1_dim, z3_dim)
    w4, b4 = linear(k4, z3_dim, z4_dim)
    wo, bo = linear(k5, z2_dim + z4_dim, 1)
    return (w1, b1, w2, b2, w3, b3, w4, b4, wo, bo)


def reference_forward(x, params):
    """Pure-JAX reference identical to the PyTorch forward."""
    (w1, b1, w2, b2, w3, b3, w4, b4, wo, bo) = params
    z1 = x @ w1 + b1
    z2 = z1 @ w2 + b2
    z3 = z1 @ w3 + b3
    z4 = z3 @ w4 + b4
    out = jnp.concatenate((z2, z4), axis=1) @ wo + bo
    return jax.nn.sigmoid(out)


if __name__ == "__main__":
    key = jax.random.PRNGKey(0)
    kx, kp, kx2 = jax.random.split(key, 3)

    # Small shapes consistent with the module's forward.
    B, in_dim = 8, 32
    z1_dim, z2_dim, z3_dim, z4_dim = 16, 16, 16, 16

    x = jax.random.normal(kx, (B, in_dim), jnp.float32)
    params = init_params(kp, in_dim, z1_dim, z2_dim, z3_dim, z4_dim)

    y = jax.block_until_ready(mlp_forward(x, params))
    y_ref = reference_forward(x, params)
    assert y.shape == (B, 1)
    assert jnp.allclose(y, y_ref, atol=2e-5, rtol=2e-5), \
        float(jnp.max(jnp.abs(y - y_ref)))

    # Multi-tile path: exercises batch padding and a grid with >1 steps.
    B2 = 300
    x2 = jax.random.normal(kx2, (B2, in_dim), jnp.float32)
    y2 = jax.block_until_ready(mlp_forward(x2, params, batch_tile=128))
    y2_ref = reference_forward(x2, params)
    assert y2.shape == (B2, 1)
    assert jnp.allclose(y2, y2_ref, atol=2e-5, rtol=2e-5), \
        float(jnp.max(jnp.abs(y2 - y2_ref)))

    print("KERNEL_OK")
</pallas_src>

<mosaic_0001>
module attributes {stable_mosaic.version = 11 : i64} {
  func.func @_gemv_sigmoid_kernel(%arg0: i32, %arg1: memref<8x32xf32, #tpu.memory_space<vmem>>, %arg2: memref<1x32xf32, #tpu.memory_space<vmem>>, %arg3: memref<1x1xf32, #tpu.memory_space<smem>>, %arg4: memref<8x1xf32, #tpu.memory_space<vmem>>) attributes {dimension_semantics = [#tpu.dimension_semantics<parallel>], iteration_bounds = array<i64: 1>, scalar_prefetch = 0 : i64, scratch_operands = 0 : i64, tpu.core_type = #tpu.core_type<tc>, window_params = [{transform_indices = @transform_0, window_bounds = array<i64: 8, 32>}, {pipeline_mode = #tpu.pipeline_mode<synchronous>, transform_indices = @transform_1, window_bounds = array<i64: 1, 32>}, {transform_indices = @transform_2, window_bounds = array<i64: 1, 1>}, {transform_indices = @transform_3, window_bounds = array<i64: 8, 1>}]} {
    %c0 = arith.constant 0 : index
    %c0_0 = arith.constant 0 : index
    %0 = vector.load %arg1[%c0, %c0_0] : memref<8x32xf32, #tpu.memory_space<vmem>>, vector<8x32xf32>
    %c0_1 = arith.constant 0 : index
    %c0_2 = arith.constant 0 : index
    %1 = vector.load %arg2[%c0_1, %c0_2] : memref<1x32xf32, #tpu.memory_space<vmem>>, vector<1x32xf32>
    %c0_3 = arith.constant 0 : index
    %c0_4 = arith.constant 0 : index
    %2 = memref.load %arg3[%c0_3, %c0_4] : memref<1x1xf32, #tpu.memory_space<smem>>
    %3 = vector.broadcast %1 : vector<1x32xf32> to vector<8x32xf32>
    %4 = arith.mulf %0, %3 : vector<8x32xf32>
    %cst = arith.constant dense<0.000000e+00> : vector<8xf32>
    %5 = vector.multi_reduction <add>, %4, %cst [1] : vector<8x32xf32> to vector<8xf32>
    %6 = vector.shape_cast %5 : vector<8xf32> to vector<8x1xf32>
    %7 = vector.broadcast %2 : f32 to vector<8x1xf32>
    %8 = arith.addf %6, %7 : vector<8x1xf32>
    %9 = arith.negf %8 : vector<8x1xf32>
    %10 = math.exp %9 : vector<8x1xf32>
    %cst_5 = arith.constant 1.000000e+00 : f32
    %11 = vector.broadcast %cst_5 : f32 to vector<8x1xf32>
    %12 = arith.addf %11, %10 : vector<8x1xf32>
    %13 = arith.divf %11, %12 : vector<8x1xf32>
    %c0_6 = arith.constant 0 : index
    %c0_7 = arith.constant 0 : index
    %14 = vector.load %arg4[%c0_6, %c0_7] : memref<8x1xf32, #tpu.memory_space<vmem>>, vector<8x1xf32>
    tpu.vector_store %arg4[%c0_6, %c0_7], %13 {strides = array<i32>} : memref<8x1xf32, #tpu.memory_space<vmem>>, vector<8x1xf32>,
    return
  }
  func.func @transform_0(%arg0: i32) -> (i32, i32) {
    %c0_i32 = arith.constant 0 : i32
    %c0_i32_0 = arith.constant 0 : i32
    return %arg0, %c0_i32 : i32, i32
  }
  func.func @transform_1(%arg0: i32) -> (i32, i32) {
    %c0_i32 = arith.constant 0 : i32
    %c0_i32_0 = arith.constant 0 : i32
    %c0_i32_1 = arith.constant 0 : i32
    return %c0_i32, %c0_i32_0 : i32, i32
  }
  func.func @transform_2(%arg0: i32) -> (i32, i32) {
    %c0_i32 = arith.constant 0 : i32
    %c0_i32_0 = arith.constant 0 : i32
    %c0_i32_1 = arith.constant 0 : i32
    return %c0_i32, %c0_i32_0 : i32, i32
  }
  func.func @transform_3(%arg0: i32) -> (i32, i32) {
    %c0_i32 = arith.constant 0 : i32
    %c0_i32_0 = arith.constant 0 : i32
    return %arg0, %c0_i32 : i32, i32
  }
}

</mosaic_0001>

<bundles_post_ra>
// kernel: mlp_forward.1
= control target key start
LH: loop header
LB: loop body
LE: loop exit
PB: predicated region body
PF: predicated region fallthrough
CT: control target
= control target key end

     0   :  { %vm22_vm0 = vcmask 261120   ;;  %vm47_vm4 = vcmask 7168   ;;  %s91_s0 = inlined_call_operand.vmem [shape: f32[8,32], index: 0, kind: input, shape index: {}]   ;;  %s92_s1 = inlined_call_operand.vmem [shape: f32[1,32], index: 1, kind: input, shape index: {}]   ;;  %s93_s2 = inlined_call_operand.<no memory space> [shape: f32[1,1], index: 2, kind: input, shape index: {}]   ;;  %s94_s3 = inlined_call_operand.vmem [shape: f32[8,1], index: 3, kind: output, shape index: {}]  }
   0x1   :  { %v15_v0 = vld [vmem:[%s91_s0] sm:$0xff]  ;;  %v26_v4 = vstv %s93_s2 }
   0x2   :  { %v54_v1 = vld [vmem:[%s92_s1] ss:$0 sm:$0xff] }
   0x3   :  { %v21_v2 = vmul.f32 %v54_v1, %v15_v0 }
   0x5   :  { %v23_v3 = vsel %vm22_vm0, %v21_v2, 0.0 }
   0x6   :  { %24 = vadd.xlane.f32.xlu0 %v23_v3 }
  0x79   :  { %v25_v5 = vpop.xlane.xlu0 %24 }
  0x7a   :  { %v27_v6 = vadd.f32 %v26_v4, %v25_v5 }
  0x7c   :  { %v53_v7 = vmul.f32 -1.442695, %v27_v6 }
  0x7e   :  { %55 = vpow2.f32 %v53_v7 }
  0x84   :  { %v56_v8 = vpop.eup %55 }
  0x85   :  { %v31_v9 = vadd.f32 1.0, %v56_v8 }
  0x87   :  { %57 = vrcp.f32 %v31_v9  ;;  %v43_v13 = vand.u32 2147483648, %v31_v9  ;;  %v41_v15 = vand.u32 2147483647, %v31_v9  ;;  %vm37_vm2 = vweird.f32 %v31_v9 }
  0x89   :  { %v44_v17 = vor.u32 1.1754944e-38, %v43_v13  ;;  %vm42_vm5 = vcmp.eq.f32.partialorder %v41_v15, 8.507059e+37 }
  0x8d   :  { %v58_v10 = vpop.eup %57 }
  0x8e   :  { %v33_v11 = vmul.f32 %v58_v10, %v31_v9  ;;  %vm38_vm1 = vweird.f32 %v58_v10 }
  0x8f   :  { %vm39_vm3 = vmor %vm37_vm2, %vm38_vm1 }
  0x90   :  { %v34_v12 = vsub.f32 1.0, %v33_v11 }
  0x92   :  { %v35_v14 = vmul.f32 %v58_v10, %v34_v12 }
  0x94   :  { %v36_v16 = vadd.f32 %v58_v10, %v35_v14 }
  0x96   :  { %v40_v18 = vsel %vm39_vm3, %v58_v10, %v36_v16 }
  0x97   :  { %v45_v19 = vsel %vm42_vm5, %v44_v17, %v40_v18 }
  0x98   :  { %48 = vst.msk [vmem:[%s94_s3] sm:$0xff] %vm47_vm4, %v45_v19 }

</bundles_post_ra>
